<compile_context>
chip_gen: v6e
topology: v6e:2x2x1
jax: 0.10.0
libtpu: 0.0.40
codegen_flags: <defaults>
</compile_context>

<pallas_src>
import jax
import jax.numpy as jnp
from jax.experimental import pallas as pl
from jax.experimental.pallas import tpu as pltpu

_LN_EPS = 1e-5


def _segmerge_kernel(x_ref, gamma_ref, beta_ref, w_ref, b_ref, o_ref):
    """Fused LayerNorm (f32) + Linear (bf16 MXU, f32 accumulate) on a (TM, K) row block."""
    x = x_ref[...].astype(jnp.float32)                     # (TM, K)
    k = x.shape[-1]
    inv_k = jnp.float32(1.0 / k)

    # One-pass LayerNorm statistics: mean = E[x], var = E[x^2] - mean^2.
    s1 = jnp.sum(x, axis=-1, keepdims=True)
    s2 = jnp.sum(x * x, axis=-1, keepdims=True)
    mean = s1 * inv_k
    var = jnp.maximum(s2 * inv_k - mean * mean, 0.0)
    inv = jax.lax.rsqrt(var + _LN_EPS)
    xn = (x - mean) * inv * gamma_ref[...] + beta_ref[...]  # (TM, K) f32

    # Projection on the MXU: bf16 inputs, f32 accumulation, bias add in f32.
    y = jnp.dot(xn.astype(jnp.bfloat16), w_ref[...],
                preferred_element_type=jnp.float32) + b_ref[...]
    o_ref[...] = y.astype(o_ref.dtype)


def _round_up(v, m):
    return ((v + m - 1) // m) * m


def _pick_row_tile(M, K, N, *, requested, x_itemsize, budget_bytes):
    """Largest row tile (multiple of 8) that fits the VMEM budget.

    VMEM accounting: x rows double-buffered, f32 output double-buffered,
    single-buffered constants (bf16 weight + f32 gamma/beta/bias).
    """
    fixed = K * N * 2 + 2 * K * 4 + N * 4
    per_row = 2 * K * x_itemsize + 2 * N * 4
    cap = max((budget_bytes - fixed) // per_row, 8)
    tm = min(requested, cap, _round_up(M, 8))
    # Keep at least two grid steps so the "parallel" axis can feed both
    # TensorCores on megacore parts (v7x) whenever there is enough work.
    if M > 8 and tm >= M:
        tm = _round_up(pl.cdiv(M, 2), 8)
    tm = max(8, 8 * (tm // 8))
    return int(tm)


def seg_merging_pallas(x, params, win_size, *, row_tile=512,
                       vmem_budget_bytes=20 * 1024 * 1024):
    """
    x:       (B, ts_d, seg_num, d_model) float32
    params:  dict with 'gamma' (K,), 'beta' (K,), 'weight' (K, d_model), 'bias' (d_model,)
             where K = win_size * d_model
    returns: (B, ts_d, ceil(seg_num / win_size), d_model)
    """
    B, ts_d, seg_num, d_model = x.shape
    w = win_size
    K = w * d_model

    # --- glue: pad + window merge (pure index shuffling, no compute) ---
    pad_num = seg_num % w
    if pad_num != 0:
        pad_num = w - pad_num
        # TODO(synk): handle the repeated-tail padding in-kernel (scalar-prefetched
        # row->segment offsets) to avoid this HBM copy of x; only hit when
        # seg_num % win_size != 0.
        x = jnp.concatenate([x, x[:, :, -pad_num:, :]], axis=-2)
    Lm = x.shape[2] // w
    # concat([x[:, :, i::w, :] for i in range(w)], -1) == reshape(B, ts_d, Lm, w*d)
    M = B * ts_d * Lm
    x2d = x.reshape(M, K)

    gamma = params["gamma"].reshape(1, K).astype(jnp.float32)
    beta = params["beta"].reshape(1, K).astype(jnp.float32)
    weight = params["weight"].astype(jnp.bfloat16)            # (K, d_model), bf16 for the MXU
    bias = params["bias"].reshape(1, d_model).astype(jnp.float32)

    tm = _pick_row_tile(M, K, d_model, requested=row_tile,
                        x_itemsize=x2d.dtype.itemsize,
                        budget_bytes=vmem_budget_bytes)
    grid = (pl.cdiv(M, tm),)   # last block masked if tm does not divide M

    cost = pl.CostEstimate(
        flops=2 * M * K * d_model,
        transcendentals=0,
        bytes_accessed=(M * K * x2d.dtype.itemsize      # x
                        + K * d_model * 2               # bf16 weight
                        + M * d_model * x.dtype.itemsize  # output
                        + 4 * (2 * K + d_model)),        # gamma/beta/bias
    )

    def _const_spec(shape):
        # Grid-invariant operands: no need for double-buffering -> save VMEM.
        return pl.BlockSpec(shape, lambda i: (0, 0), pipeline_mode=pl.Buffered(1))

    # NOTE: for d_model < 128 the output store is lane-masked (vst.msk); pad
    # d_model to a multiple of 128 at the model level for full store bandwidth.
    out2d = pl.pallas_call(
        _segmerge_kernel,
        out_shape=jax.ShapeDtypeStruct((M, d_model), x.dtype),
        grid_spec=pltpu.PrefetchScalarGridSpec(
            num_scalar_prefetch=0,
            grid=grid,
            in_specs=[
                pl.BlockSpec((tm, K), lambda i: (i, 0)),          # x rows
                _const_spec((1, K)),                              # gamma
                _const_spec((1, K)),                              # beta
                _const_spec((K, d_model)),                        # weight (bf16)
                _const_spec((1, d_model)),                        # bias
            ],
            out_specs=pl.BlockSpec((tm, d_model), lambda i: (i, 0)),
        ),
        compiler_params=pltpu.CompilerParams(
            dimension_semantics=("parallel",),
            vmem_limit_bytes=32 * 1024 * 1024,
        ),
        cost_estimate=cost,
    )(x2d, gamma, beta, weight, bias)

    return out2d.reshape(B, ts_d, Lm, d_model)


def init_params(key, d_model, win_size):
    """Deterministic synthetic parameter init (matches nn.Module shapes)."""
    K = win_size * d_model
    k_w, k_b = jax.random.split(key)
    # nn.Linear(win_size*d_model, d_model): torch weight (d_model, K) -> stored transposed (K, d_model)
    bound = 1.0 / jnp.sqrt(K)
    weight = jax.random.uniform(k_w, (K, d_model), jnp.float32, -bound, bound)
    bias = jax.random.uniform(k_b, (d_model,), jnp.float32, -bound, bound)
    gamma = jnp.ones((K,), jnp.float32)    # nn.LayerNorm default affine init
    beta = jnp.zeros((K,), jnp.float32)
    return {"gamma": gamma, "beta": beta, "weight": weight, "bias": bias}


def seg_merging_ref(x, params, win_size):
    """Pure-JAX f32 reference mirroring the PyTorch forward."""
    B, ts_d, seg_num, d_model = x.shape
    w = win_size
    pad_num = seg_num % w
    if pad_num != 0:
        pad_num = w - pad_num
        x = jnp.concatenate([x, x[:, :, -pad_num:, :]], axis=-2)
    segs = [x[:, :, i::w, :] for i in range(w)]
    xm = jnp.concatenate(segs, axis=-1)                      # (B, ts_d, Lm, w*d)
    mean = jnp.mean(xm, axis=-1, keepdims=True)
    var = jnp.mean((xm - mean) ** 2, axis=-1, keepdims=True)
    xn = (xm - mean) / jnp.sqrt(var + _LN_EPS)
    xn = xn * params["gamma"] + params["beta"]
    return xn @ params["weight"] + params["bias"]


if __name__ == "__main__":
    def _run_case(case_key, B, ts_d, seg_num, d_model, win_size):
        k_x, k_p = jax.random.split(case_key)
        x = jax.random.normal(k_x, (B, ts_d, seg_num, d_model), jnp.float32)
        params = init_params(k_p, d_model, win_size)

        out = jax.block_until_ready(seg_merging_pallas(x, params, win_size))
        ref = seg_merging_ref(x, params, win_size)

        Lm = -(-seg_num // win_size)
        assert out.shape == (B, ts_d, Lm, d_model), out.shape
        # bf16 MXU operands -> slightly looser tolerance than the f32 reference.
        err = float(jnp.max(jnp.abs(out - ref)))
        assert jnp.allclose(out, ref, atol=3e-2, rtol=3e-2), err

    keys = jax.random.split(jax.random.PRNGKey(0), 3)
    _run_case(keys[0], B=2, ts_d=4, seg_num=8, d_model=32, win_size=2)  # main case
    _run_case(keys[1], B=2, ts_d=3, seg_num=7, d_model=32, win_size=2)  # pad path (seg_num % w != 0)
    _run_case(keys[2], B=1, ts_d=3, seg_num=6, d_model=32, win_size=2)  # M=9 -> masked partial row block

    print("KERNEL_OK")
</pallas_src>

<mosaic_0001>
module attributes {stable_mosaic.version = 11 : i64} {
  func.func @_segmerge_kernel(%arg0: i32, %arg1: memref<16x64xf32, #tpu.memory_space<vmem>>, %arg2: memref<1x64xf32, #tpu.memory_space<vmem>>, %arg3: memref<1x64xf32, #tpu.memory_space<vmem>>, %arg4: memref<64x32xbf16, #tpu.memory_space<vmem>>, %arg5: memref<1x32xf32, #tpu.memory_space<vmem>>, %arg6: memref<16x32xf32, #tpu.memory_space<vmem>>) attributes {dimension_semantics = [#tpu.dimension_semantics<parallel>], iteration_bounds = array<i64: 2>, scalar_prefetch = 0 : i64, scratch_operands = 0 : i64, tpu.core_type = #tpu.core_type<tc>, window_params = [{transform_indices = @transform_0, window_bounds = array<i64: 16, 64>}, {pipeline_mode = #tpu.pipeline_mode<synchronous>, transform_indices = @transform_1, window_bounds = array<i64: 1, 64>}, {pipeline_mode = #tpu.pipeline_mode<synchronous>, transform_indices = @transform_2, window_bounds = array<i64: 1, 64>}, {pipeline_mode = #tpu.pipeline_mode<synchronous>, transform_indices = @transform_3, window_bounds = array<i64: 64, 32>}, {pipeline_mode = #tpu.pipeline_mode<synchronous>, transform_indices = @transform_4, window_bounds = array<i64: 1, 32>}, {transform_indices = @transform_5, window_bounds = array<i64: 16, 32>}]} {
    %c0 = arith.constant 0 : index
    %c0_0 = arith.constant 0 : index
    %0 = vector.load %arg1[%c0, %c0_0] : memref<16x64xf32, #tpu.memory_space<vmem>>, vector<16x64xf32>
    %cst = arith.constant dense<0.000000e+00> : vector<16xf32>
    %1 = vector.multi_reduction <add>, %0, %cst [1] : vector<16x64xf32> to vector<16xf32>
    %2 = vector.shape_cast %1 : vector<16xf32> to vector<16x1xf32>
    %3 = arith.mulf %0, %0 : vector<16x64xf32>
    %cst_1 = arith.constant dense<0.000000e+00> : vector<16xf32>
    %4 = vector.multi_reduction <add>, %3, %cst_1 [1] : vector<16x64xf32> to vector<16xf32>
    %5 = vector.shape_cast %4 : vector<16xf32> to vector<16x1xf32>
    %cst_2 = arith.constant 1.562500e-02 : f32
    %6 = vector.broadcast %cst_2 : f32 to vector<16x1xf32>
    %7 = arith.mulf %2, %6 : vector<16x1xf32>
    %cst_3 = arith.constant 1.562500e-02 : f32
    %8 = vector.broadcast %cst_3 : f32 to vector<16x1xf32>
    %9 = arith.mulf %5, %8 : vector<16x1xf32>
    %10 = arith.mulf %7, %7 : vector<16x1xf32>
    %11 = arith.subf %9, %10 : vector<16x1xf32>
    %cst_4 = arith.constant 0.000000e+00 : f32
    %12 = vector.broadcast %cst_4 : f32 to vector<16x1xf32>
    %13 = arith.maximumf %11, %12 : vector<16x1xf32>
    %cst_5 = arith.constant 9.99999974E-6 : f32
    %14 = vector.broadcast %cst_5 : f32 to vector<16x1xf32>
    %15 = arith.addf %13, %14 : vector<16x1xf32>
    %16 = math.rsqrt %15 : vector<16x1xf32>
    %17 = vector.broadcast %7 : vector<16x1xf32> to vector<16x64xf32>
    %18 = arith.subf %0, %17 : vector<16x64xf32>
    %19 = vector.broadcast %16 : vector<16x1xf32> to vector<16x64xf32>
    %20 = arith.mulf %18, %19 : vector<16x64xf32>
    %c0_6 = arith.constant 0 : index
    %c0_7 = arith.constant 0 : index
    %21 = vector.load %arg2[%c0_6, %c0_7] : memref<1x64xf32, #tpu.memory_space<vmem>>, vector<1x64xf32>
    %22 = vector.broadcast %21 : vector<1x64xf32> to vector<16x64xf32>
    %23 = arith.mulf %20, %22 : vector<16x64xf32>
    %c0_8 = arith.constant 0 : index
    %c0_9 = arith.constant 0 : index
    %24 = vector.load %arg3[%c0_8, %c0_9] : memref<1x64xf32, #tpu.memory_space<vmem>>, vector<1x64xf32>
    %25 = vector.broadcast %24 : vector<1x64xf32> to vector<16x64xf32>
    %26 = arith.addf %23, %25 : vector<16x64xf32>
    %27 = arith.truncf %26 : vector<16x64xf32> to vector<16x64xbf16>
    %c0_10 = arith.constant 0 : index
    %c0_11 = arith.constant 0 : index
    %28 = vector.load %arg4[%c0_10, %c0_11] : memref<64x32xbf16, #tpu.memory_space<vmem>>, vector<64x32xbf16>
    %cst_12 = arith.constant dense<0.000000e+00> : vector<16x32xf32>
    %29 = tpu.matmul %27, %28, %cst_12 {dimension_numbers = #tpu.dot_dimension_numbers<[1], [0], [0], [1], [0, 0, 1, 1], [], []>} : vector<16x64xbf16>, vector<64x32xbf16>, vector<16x32xf32> -> vector<16x32xf32>
    %c0_13 = arith.constant 0 : index
    %c0_14 = arith.constant 0 : index
    %30 = vector.load %arg5[%c0_13, %c0_14] : memref<1x32xf32, #tpu.memory_space<vmem>>, vector<1x32xf32>
    %31 = vector.broadcast %30 : vector<1x32xf32> to vector<16x32xf32>
    %32 = arith.addf %29, %31 : vector<16x32xf32>
    %c0_15 = arith.constant 0 : index
    %c0_16 = arith.constant 0 : index
    %33 = vector.load %arg6[%c0_15, %c0_16] : memref<16x32xf32, #tpu.memory_space<vmem>>, vector<16x32xf32>
    tpu.vector_store %arg6[%c0_15, %c0_16], %32 {strides = array<i32>} : memref<16x32xf32, #tpu.memory_space<vmem>>, vector<16x32xf32>,
    return
  }
  func.func @transform_0(%arg0: i32) -> (i32, i32) {
    %c0_i32 = arith.constant 0 : i32
    %c0_i32_0 = arith.constant 0 : i32
    return %arg0, %c0_i32 : i32, i32
  }
  func.func @transform_1(%arg0: i32) -> (i32, i32) {
    %c0_i32 = arith.constant 0 : i32
    %c0_i32_0 = arith.constant 0 : i32
    %c0_i32_1 = arith.constant 0 : i32
    return %c0_i32, %c0_i32_0 : i32, i32
  }
  func.func @transform_2(%arg0: i32) -> (i32, i32) {
    %c0_i32 = arith.constant 0 : i32
    %c0_i32_0 = arith.constant 0 : i32
    %c0_i32_1 = arith.constant 0 : i32
    return %c0_i32, %c0_i32_0 : i32, i32
  }
  func.func @transform_3(%arg0: i32) -> (i32, i32) {
    %c0_i32 = arith.constant 0 : i32
    %c0_i32_0 = arith.constant 0 : i32
    %c0_i32_1 = arith.constant 0 : i32
    return %c0_i32, %c0_i32_0 : i32, i32
  }
  func.func @transform_4(%arg0: i32) -> (i32, i32) {
    %c0_i32 = arith.constant 0 : i32
    %c0_i32_0 = arith.constant 0 : i32
    %c0_i32_1 = arith.constant 0 : i32
    return %c0_i32, %c0_i32_0 : i32, i32
  }
  func.func @transform_5(%arg0: i32) -> (i32, i32) {
    %c0_i32 = arith.constant 0 : i32
    %c0_i32_0 = arith.constant 0 : i32
    return %arg0, %c0_i32 : i32, i32
  }
}

</mosaic_0001>

<bundles_post_ra>
// kernel: tpu_custom_call.1
= control target key start
LH: loop header
LB: loop body
LE: loop exit
PB: predicated region body
PF: predicated region fallthrough
CT: control target
= control target key end

     0   :  { %10 = vsyncpa [#allocation3], 0  ;;  %s756_s0 = inlined_call_operand.vmem [shape: f32[32,64], index: 0, kind: input, shape index: {}]   ;;  %s757_s1 = inlined_call_operand.vmem [shape: f32[1,64], index: 1, kind: input, shape index: {}]   ;;  %s758_s2 = inlined_call_operand.vmem [shape: f32[1,64], index: 2, kind: input, shape index: {}]   ;;  %s759_s3 = inlined_call_operand.vmem [shape: bf16[64,32], index: 3, kind: input, shape index: {}]   ;;  %s760_s4 = inlined_call_operand.vmem [shape: f32[1,32], index: 4, kind: input, shape index: {}]   ;;  %s761_s5 = inlined_call_operand.hbm [shape: f32[32,32], index: 5, kind: output, shape index: {}]  }
   0x1   :  { %12 = vsyncpa [#allocation3 + $0x1], 0  ;;  %s629_s18 = smov 0   ;;  %s631_s19 = smov 0  }
   0x2   :  { %s633_s20 = smov 0   ;;  %s635_s21 = smov 0  }
   0x3 LB: > { %s650_s22 = sadd.s32 4294967295, %s592_s21   ;;  %s443_s23 = sadd.s32 4294967294, %s592_s21   ;;  %s592_s21 = sphi %s635_s21, %s767_s21   ;;  %s588_s20 = sphi %s633_s20, %s766_s20   ;;  %s584_s19 = sphi %s631_s19, %s765_s19   ;;  %s580_s18 = sphi %s629_s18, %s764_s18  }
   0x4   : > { %s654_s24 = sadd.s32 1, %s592_s21   ;;  %s135_s25 = sadd.s32 1, %s588_s20 }
   0x5   : > { %s132_s26 = ssub.s32 %s592_s21, %s654_s24  ;;  %p145_p0 = scmp.ne.s32.totalorder %s588_s20, %s584_s19 }
   0x6   : > { %p133_p1 = scmp.eq.s32.totalorder %s132_s26, 0  ;;  %p146_p2 = scmp.eq.s32.totalorder %s650_s22, 1 }
   0x7   : > { %p151_p3 = scmp.ne.s32.totalorder %s584_s19, %s580_s18  ;;  %p152_p4 = scmp.eq.s32.totalorder %s443_s23, 1 }
   0x8   : > { %s665_s27 = scalar_select %p133_p1, %s588_s20, %s135_s25  }
   0x9   : > { %p667_p5 = por %p146_p2, %p145_p0  ;;  %p671_p6 = por %p152_p4, %p151_p3 }
   0xa   : > { %p446_p7 = scmp.ge.s32.totalorder %s592_s21, 1  ;;  %p191_p8 = scmp.lt.s32.totalorder %s592_s21, 3 }
   0xc   : > { %p192_p9 = pnand %p446_p7, %p191_p8 }
   0xd   : > { %s448_s30 = sshll.u32 (!%p192_p9), %s650_s22, 1  ;;  %s463_s12 = sshll.u32 (!%p192_p9), %s650_s22, 8 }
   0xe   : > { %195 = sbr.rel (%p192_p9) target bundleno = 411 (0x19b), region = 40  ;;  %p220_p10 = scmp.lt.s32.totalorder (!%p192_p9), %s448_s30, 3 }
   0xf   : > { %s714_s15 = scalar_lea.hbm (!%p192_p9), %s761_s5, %s463_s12  ;;  %s596_s22 = smov (!%p192_p9), [#allocation2]  }
  0x10   : > { %s536_s23 = sshll.u32 (!%p192_p9), %s596_s22, 4  ;;  %s537_s23 = int_to_ptr.vmem [resolvable:$false] %s536_s23 }
  0x11   : > { %s538_s25 = scalar_lea.vmem (!%p192_p9), %s537_s23, 512 }
  0x13   : > { %s769_s30 = smov (!%p220_p10, %s448_s30), 3  ;;  %vm229_vm0 = vcmask 523264   ;;  %v524_v8 = vld [vmem:[%s759_s3 + $0x18] sm:$0xff]   ;;  %v594_v9 = vmov 0.0   ;;  %vm595_vm1 = vmmov 0   ;;  %v525_v10 = vld [vmem:[%s759_s3 + $0x10] sm:$0xff]  }
  0x14   : > { %s449_s6 = sshll.u32 %s769_s30, 3  ;;  %469 = vmatprep.subr.bf16.mxu0 %v594_v9  ;;  %477 = vmatprep.mubr.msk.bf16.mxu0 %vm595_vm1, %v594_v9  ;;  %v526_v11 = vld [vmem:[%s759_s3 + $0x8] sm:$0xff]   ;;  %v527_v12 = vld [vmem:[%s759_s3] sm:$0xff]   ;;  %vm364_vm2 = vcmask 261120  }
  0x15   : > { %s223_s9 = scalar_lea.vmem %s756_s0, %s449_s6  ;;  %470 = vmatpush3.bf16.msra.mxu0 %v524_v8  ;;  %v450_v32 = vld [vmem:[%s757_s1] ss:$0 sm:$0xff]  ;;  %s216_s6 = sand.u32 1, %s584_s19  }
  0x16   : > { %v227_v0 = vld [vmem:[%s223_s9] sm:$0xff]  ;;  %v228_v1 = vld [vmem:[%s223_s9 + $0x8] sm:$0xff]  ;;  %471 = vmatprep.subr.bf16.mxu0 %v594_v9  ;;  %s447_s7 = sshll.u32 %s216_s6, 4  ;;  %s716_s16 = scalar_lea.sflag [#allocation3], %s216_s6 }
  0x17   : > { %v230_v2 = vsel %vm229_vm0, %v227_v0, 0.0  ;;  %v236_v3 = vmul.f32 %v227_v0, %v227_v0  ;;  %v237_v4 = vmul.f32 %v228_v1, %v228_v1  ;;  %v233_v6 = vsel %vm229_vm0, %v228_v1, 0.0  ;;  %v451_v37 = vld [vmem:[%s758_s2] ss:$0 sm:$0xff]  ;;  %s218_s10 = scalar_lea.vmem [#allocation2], %s447_s7 }
  0x18   : > { %231 = vadd.xlane.f32.xlu0 %v230_v2  ;;  %v452_v42 = vld [vmem:[%s760_s4] ss:$0 sm:$0xff]  ;;  %s381_s11 = sshll.u32 %s218_s10, 4  ;;  %s709_s11 = int_to_ptr.vmem [resolvable:$true] %s381_s11 }
  0x19   : > { %v238_v5 = vsel %vm229_vm0, %v236_v3, 0.0  ;;  %v241_v7 = vsel %vm229_vm0, %v237_v4, 0.0  ;;  %472 = vmatpush3.bf16.msra.mxu0 %v525_v10  ;;  %s532_s17 = scalar_lea.vmem %s709_s11, 256  ;;  %p539_p0 = scmp.lt.s32.totalorder %s709_s11, %s537_s23 }
  0x1a   : > { %239 = vadd.xlane.f32.xlu1 %v238_v5  ;;  %473 = vmatprep.subr.bf16.mxu0 %v594_v9  ;;  %p533_p11 = scmp.ne.s32.totalorder %s709_s11, %s532_s17  ;;  %p540_p1 = scmp.lt.s32.totalorder %s538_s25, %s532_s17 }
  0x1c   : > { %234 = vadd.xlane.f32.xlu0 %v233_v6  ;;  %p534_p12 = pnand %p533_p11, %p667_p5  ;;  %p541_p2 = por %p540_p1, %p539_p0 }
  0x1d   : > { %474 = vmatpush3.bf16.msra.mxu0 %v526_v11 }
  0x1e   : > { %242 = vadd.xlane.f32.xlu1 %v241_v7  ;;  %475 = vmatprep.subr.bf16.mxu0 %v594_v9  ;;  %p535_p13 = pneg %p534_p12 }
  0x20   : > { %p542_p3 = pnand %p541_p2, %p535_p13 }
  0x21   : > { %476 = vmatpush3.bf16.msra.mxu0 %v527_v12 }
  0xa1   : > { %v232_v13 = vpop.xlane.xlu0 %231 }
  0xa2   : > { %v244_v14 = vmul.f32 0.015625, %v232_v13 }
  0xa3   : > { %v240_v15 = vpop.xlane.xlu1 %239 }
  0xa4   : > { %v248_v16 = vmul.f32 %v244_v14, %v244_v14  ;;  %v246_v17 = vmul.f32 0.015625, %v240_v15  ;;  %v258_v29 = vsub.f32 %v227_v0, %v244_v14 }
  0xa5   : > { %v235_v18 = vpop.xlane.xlu0 %234 }
  0xa6   : > { %v250_v19 = vsub.f32 %v246_v17, %v248_v16  ;;  %v245_v20 = vmul.f32 0.015625, %v235_v18 }
  0xa7   : > { %v243_v21 = vpop.xlane.xlu1 %242 }
  0xa8   : > { %v252_v22 = vmax.f32 %v250_v19, 0.0  ;;  %v249_v23 = vmul.f32 %v245_v20, %v245_v20  ;;  %v247_v24 = vmul.f32 0.015625, %v243_v21  ;;  %v259_v33 = vsub.f32 %v228_v1, %v245_v20 }
  0xaa   : > { %v254_v25 = vadd.f32 1e-05, %v252_v22  ;;  %v251_v26 = vsub.f32 %v247_v24, %v249_v23 }
  0xac   : > { %528 = vrsqrt.f32 %v254_v25  ;;  %v253_v27 = vmax.f32 %v251_v26, 0.0 }
  0xae   : > { %v255_v28 = vadd.f32 1e-05, %v253_v27 }
  0xb0   : > { %530 = vrsqrt.f32 %v255_v28 }
  0xb9   : > { %v529_v30 = vpop.eup %528 }
  0xba   : > { %v260_v31 = vmul.f32 %v529_v30, %v258_v29 }
  0xbc   : > { %v269_v36 = vmul.f32 %v450_v32, %v260_v31 }
  0xbd   : > { %v531_v34 = vpop.eup %530 }
  0xbe   : > { %v261_v35 = vmul.f32 %v531_v34, %v259_v33  ;;  %v278_v39 = vadd.f32 %v451_v37, %v269_v36 }
  0xc0   : > { %v270_v38 = vmul.f32 %v450_v32, %v261_v35 }
  0xc2   : > { %v279_v40 = vadd.f32 %v451_v37, %v270_v38 }
  0xc4   : > { %v280_v41 = vpack.c.bf16 %v279_v40, %v278_v39 }
  0xc6   : > { %478 = vmatmul.mubr.msk.bf16.vlgmr.msra.gmra.mxu0 %vm229_vm0, %v280_v41 }
 0x186   : > { %v357_v43 = vpop.f32.mrf.mxu0 }
 0x187   : > { %v358_v44 = vadd.f32 %v452_v42, %v357_v43 }
 0x188   : > { %v479_v45 = vpop.f32.mrf.mxu0 }
 0x189   : > { %365 = vst.msk [vmem:[%s218_s10] sm:$0xff] %vm364_vm2, %v358_v44 }
 0x18a   : > { %v360_v46 = vpop.f32.mrf.mxu0 }
 0x18b   : > { %v361_v47 = vadd.f32 %v452_v42, %v360_v46 }
 0x18c   : > { %v480_v48 = vpop.f32.mrf.mxu0 }
 0x18d   : > { %366 = vst.msk [vmem:[%s218_s10 + $0x8] sm:$0xff] %vm364_vm2, %v361_v47 }
 0x18e   : > { %545 = shalt.err (!%p542_p3)
}
 0x18f   : > { %s546_s26 = scalar_lea.hbm %s714_s15, 256  ;;  %s550_s7 = scalar_lea.hbm %s761_s5, 512 }
 0x190   : > { %p547_p4 = scmp.ne.s32.totalorder %s714_s15, %s546_s26  ;;  %p551_p9 = scmp.lt.s32.totalorder %s714_s15, %s761_s5 }
 0x191   : > { %p552_p10 = scmp.lt.s32.totalorder %s550_s7, %s546_s26 }
 0x192   : > { %p548_p7 = pnand %p547_p4, %p667_p5 }
 0x193   : > { %p553_p11 = por %p552_p10, %p551_p9 }
 0x194   : > { %p549_p8 = pneg %p548_p7 }
 0x196   : > { %p554_p12 = pnand %p553_p11, %p549_p8 }
 0x198   : > { %557 = shalt.err (!%p554_p12)
}
 0x199   : > { %s597_s10 = smov 128   ;;  %s598_s12 = smov 8  }
 0x19a   : > { %481 = dma.vmem_to_hbm [thread:$0]  (%p667_p5), %s709_s11, 256, %s714_s15, %s716_s16, %s597_s10, %s597_s10, %s598_s12  }
 0x19b PF: > { %p487_p13 = scmp.ge.s32.totalorder %s592_s21, 2  ;;  %s396_s13 = sand.u32 1, %s580_s18  }
 0x19c   : > { %s397_s14 = scalar_lea.sflag [#allocation3], %s396_s13 }
 0x19d   : > { %p484_p0 = pnand %p487_p13, %p671_p6 }
 0x19f   : > { %p485_p1 = pneg %p484_p0 }
 0x1a1   : > { %575 = dma.done.wait (%p485_p1), %s397_s14, 256  }
 0x1a2   : > { %577 = vsyncadd (%p485_p1), %s397_s14, 4294967040  ;;  %p15_p2 = scmp.ge.s32.totalorder %s654_s24, 4   ;;  %s764_s18 = smov %s584_s19 }
 0x1a3   : > { %s765_s19 = smov %s588_s20  ;;  %s766_s20 = smov %s665_s27 }
 0x1a4   : > { %s767_s21 = smov %s654_s24  ;;  %17 = sbr.rel (!%p15_p2) target bundleno = 3 (0x3), region = 75 }
 0x1a9   :  { %402 = vsyncpa [#allocation3], 1 }
 0x1aa   :  { %404 = vsyncpa [#allocation3 + $0x1], 1 }

</bundles_post_ra>
